<compile_context>
chip_gen: v6e
topology: v6e:2x2x1
jax: 0.10.0
libtpu: 0.0.40
codegen_flags: <defaults>
</compile_context>

<pallas_src>
import functools
import math

import jax
import jax.numpy as jnp
from jax.experimental import pallas as pl
from jax.experimental.pallas import tpu as pltpu

_LANE = 128
_MAX_LANE_DIM = 8192            # widest lane-dense slab taken from the model dim
_BLOCK_BUDGET_CAP = 16 << 20    # per-step block budget (bytes), pre double-buffering
_FALLBACK_BLOCK_CAP = 4 << 20   # smaller budget for the irregular fallback path


def _vmem_capacity_bytes() -> int:
    """Physical VMEM of the current chip; conservative fallback if unknown."""
    try:
        cap = int(getattr(pltpu.get_tpu_info(), "vmem_capacity_bytes", 0))
        if cap > 0:
            return cap
    except Exception:
        pass
    return 64 << 20  # v7x per-TensorCore VMEM (smallest of v5e/v6e/v7x)


def _sublane_multiple(dtype) -> int:
    # 8 for f32, 16 for bf16, 32 for int8/fp8: keeps packed sublane rows full.
    return max(8, 32 // jnp.dtype(dtype).itemsize)


def _round_up(a: int, m: int) -> int:
    return ((a + m - 1) // m) * m


def _mean_rows_kernel(x_ref, o_ref, *, n, inv_n):
    # x_ref: (N, TR, LANES).  Unrolled f32 accumulate over the leading branch
    # axis: cheap leading-dim offset indexing, no big f32 temp for bf16 input.
    acc = x_ref[0].astype(jnp.float32)
    for i in range(1, n):
        acc = acc + x_ref[i].astype(jnp.float32)
    o_ref[...] = (acc * inv_n).astype(o_ref.dtype)


def _mean_flat_kernel(x_ref, o_ref, *, inv_n):
    # Fallback for totals that are not a multiple of 128.  x_ref: (N, TC).
    s = jnp.sum(x_ref[...].astype(jnp.float32), axis=0)
    o_ref[...] = (s * inv_n).astype(o_ref.dtype)


def blend_layer_mean(x):
    """BlendLayerMean.forward: mean over dim 0.  x: [N, ...] -> [...]."""
    N = x.shape[0]
    out_dims = x.shape[1:]
    total = math.prod(out_dims) if out_dims else 1
    if total == 0:
        return jnp.zeros(out_dims, x.dtype)

    itemsize = jnp.dtype(x.dtype).itemsize
    inv_n = 1.0 / N
    vmem_cap = _vmem_capacity_bytes()
    cost = pl.CostEstimate(
        flops=(N + 1) * total,
        transcendentals=0,
        bytes_accessed=(N + 1) * total * itemsize,
    )

    if total % _LANE == 0:
        # --- Lane-dense main path: no pad, no output slice. ---
        last = out_dims[-1]
        lanes = last if (last % _LANE == 0 and last <= _MAX_LANE_DIM) else _LANE
        rows = total // lanes
        x3 = x.reshape(N, rows, lanes)  # free bitcast of a contiguous array

        sub = _sublane_multiple(x.dtype)
        block_budget = min(vmem_cap // 4, _BLOCK_BUDGET_CAP)
        # One "row" of work = all N input branches + one output row.
        row_bytes = lanes * (N + 1) * itemsize
        tr_cap = max(sub, (block_budget // row_bytes) // sub * sub)

        if rows <= sub:
            tr = rows  # single block; block dim == full extent is allowed
        else:
            num_tiles = pl.cdiv(rows, tr_cap)
            if rows >= 4 * sub:
                num_tiles = max(num_tiles, 2)  # keep both v7x TensorCores busy
            tr = min(_round_up(pl.cdiv(rows, num_tiles), sub),
                     _round_up(rows, sub))
        grid = (pl.cdiv(rows, tr),)

        working = 2 * tr * row_bytes  # double-buffered input + output blocks
        vmem_limit = int(min((vmem_cap * 3) // 4,
                             max(32 << 20, working + (8 << 20))))
        vmem_limit = max(vmem_limit, working + (2 << 20))
        vmem_limit = min(vmem_limit, vmem_cap - (2 << 20))

        out = pl.pallas_call(
            functools.partial(_mean_rows_kernel, n=N, inv_n=inv_n),
            out_shape=jax.ShapeDtypeStruct((rows, lanes), x.dtype),
            grid_spec=pltpu.PrefetchScalarGridSpec(
                num_scalar_prefetch=0,
                grid=grid,
                in_specs=[pl.BlockSpec((N, tr, lanes), lambda i: (0, i, 0))],
                out_specs=pl.BlockSpec((tr, lanes), lambda i: (i, 0)),
            ),
            compiler_params=pltpu.CompilerParams(
                dimension_semantics=("parallel",),
                vmem_limit_bytes=vmem_limit,
            ),
            cost_estimate=cost,
        )(x3)
        return out.reshape(out_dims)

    # --- Irregular total (not a multiple of 128): flat 2-D layout; the
    # partial last block is masked by Pallas -- still no wrapper pad/slice. ---
    x2 = x.reshape(N, total)
    block_budget = min(vmem_cap // 8, _FALLBACK_BLOCK_CAP)
    # Per-column VMEM bytes: sublane-padded (N -> mult of 8) input block,
    # output column, and the f32 upcast temp used by the in-kernel sum.
    col_bytes = (_round_up(N, 8) + 1) * itemsize + N * 4
    tc_cap = max(_LANE, (block_budget // col_bytes) // _LANE * _LANE)

    if total <= tc_cap:
        tc = total  # single block; block dim == full extent is allowed
    else:
        num_tiles = pl.cdiv(total, tc_cap)
        if total >= 4 * _LANE:
            num_tiles = max(num_tiles, 2)
        tc = min(_round_up(pl.cdiv(total, num_tiles), _LANE),
                 _round_up(total, _LANE))
    grid = (pl.cdiv(total, tc),)

    working = 2 * tc * (_round_up(N, 8) + 1) * itemsize + N * tc * 4
    vmem_limit = int(min((vmem_cap * 3) // 4,
                         max(32 << 20, working + (8 << 20))))
    vmem_limit = min(vmem_limit, vmem_cap - (2 << 20))

    out = pl.pallas_call(
        functools.partial(_mean_flat_kernel, inv_n=inv_n),
        out_shape=jax.ShapeDtypeStruct((total,), x.dtype),
        grid_spec=pltpu.PrefetchScalarGridSpec(
            num_scalar_prefetch=0,
            grid=grid,
            in_specs=[pl.BlockSpec((N, tc), lambda i: (0, i))],
            out_specs=pl.BlockSpec((tc,), lambda i: (i,)),
        ),
        compiler_params=pltpu.CompilerParams(
            dimension_semantics=("parallel",),
            vmem_limit_bytes=vmem_limit,
        ),
        cost_estimate=cost,
    )(x2)
    return out.reshape(out_dims)


if __name__ == "__main__":
    # BlendLayerMean has no learnable parameters (only stores config).
    key = jax.random.PRNGKey(0)

    # 1) Small shape consistent with the module: [num_branches, batch, seq, hidden].
    N, B, S, H = 4, 2, 8, 32
    x = jax.random.normal(key, (N, B, S, H), dtype=jnp.float32)
    out = jax.block_until_ready(blend_layer_mean(x))
    ref = jnp.mean(x, axis=0)
    assert out.shape == (B, S, H)
    assert jnp.allclose(out, ref, atol=1e-6, rtol=1e-6)

    # 2) Trailing dim a multiple of 128 -> wide-lane path (no pad, lanes=H).
    x2 = jax.random.normal(jax.random.PRNGKey(1), (3, 2, 4, 256), dtype=jnp.float32)
    out2 = jax.block_until_ready(blend_layer_mean(x2))
    assert out2.shape == (2, 4, 256)
    assert jnp.allclose(out2, jnp.mean(x2, axis=0), atol=1e-6, rtol=1e-6)

    # 3) Multi-tile grid with a masked partial last block (rows not / tiles).
    x3 = jax.random.normal(jax.random.PRNGKey(2), (2, 2, 50, 128), dtype=jnp.float32)
    out3 = jax.block_until_ready(blend_layer_mean(x3))
    assert out3.shape == (2, 50, 128)
    assert jnp.allclose(out3, jnp.mean(x3, axis=0), atol=1e-6, rtol=1e-6)

    # 4) bf16 branches: unrolled f32 accumulate, cast back to bf16.
    x4 = jax.random.normal(jax.random.PRNGKey(3), (4, 2, 8, 128)).astype(jnp.bfloat16)
    out4 = jax.block_until_ready(blend_layer_mean(x4))
    ref4 = jnp.mean(x4.astype(jnp.float32), axis=0).astype(jnp.bfloat16)
    assert out4.shape == (2, 8, 128)
    assert jnp.allclose(out4.astype(jnp.float32), ref4.astype(jnp.float32),
                        atol=1e-2, rtol=1e-2)

    # 5) Irregular total (not a multiple of 128) -> flat fallback path.
    x5 = jax.random.normal(jax.random.PRNGKey(4), (3, 2, 5, 19), dtype=jnp.float32)
    out5 = jax.block_until_ready(blend_layer_mean(x5))
    assert out5.shape == (2, 5, 19)
    assert jnp.allclose(out5, jnp.mean(x5, axis=0), atol=1e-6, rtol=1e-6)

    print("KERNEL_OK")
</pallas_src>

<mosaic_0001>
module attributes {stable_mosaic.version = 11 : i64} {
  func.func @_mean_rows_kernel(%arg0: i32, %arg1: memref<4x4x128xf32, #tpu.memory_space<vmem>>, %arg2: memref<4x128xf32, #tpu.memory_space<vmem>>) attributes {dimension_semantics = [#tpu.dimension_semantics<parallel>], iteration_bounds = array<i64: 1>, scalar_prefetch = 0 : i64, scratch_operands = 0 : i64, tpu.core_type = #tpu.core_type<tc>, window_params = [{transform_indices = @transform_0, window_bounds = array<i64: 4, 4, 128>}, {transform_indices = @transform_1, window_bounds = array<i64: 4, 128>}]} {
    %c0 = arith.constant 0 : index
    %c0_0 = arith.constant 0 : index
    %c0_1 = arith.constant 0 : index
    %0 = vector.load %arg1[%c0, %c0_0, %c0_1] : memref<4x4x128xf32, #tpu.memory_space<vmem>>, vector<1x4x128xf32>
    %1 = vector.shape_cast %0 : vector<1x4x128xf32> to vector<4x128xf32>
    %c1 = arith.constant 1 : index
    %c0_2 = arith.constant 0 : index
    %c0_3 = arith.constant 0 : index
    %2 = vector.load %arg1[%c1, %c0_2, %c0_3] : memref<4x4x128xf32, #tpu.memory_space<vmem>>, vector<1x4x128xf32>
    %3 = vector.shape_cast %2 : vector<1x4x128xf32> to vector<4x128xf32>
    %4 = arith.addf %1, %3 : vector<4x128xf32>
    %c2 = arith.constant 2 : index
    %c0_4 = arith.constant 0 : index
    %c0_5 = arith.constant 0 : index
    %5 = vector.load %arg1[%c2, %c0_4, %c0_5] : memref<4x4x128xf32, #tpu.memory_space<vmem>>, vector<1x4x128xf32>
    %6 = vector.shape_cast %5 : vector<1x4x128xf32> to vector<4x128xf32>
    %7 = arith.addf %4, %6 : vector<4x128xf32>
    %c3 = arith.constant 3 : index
    %c0_6 = arith.constant 0 : index
    %c0_7 = arith.constant 0 : index
    %8 = vector.load %arg1[%c3, %c0_6, %c0_7] : memref<4x4x128xf32, #tpu.memory_space<vmem>>, vector<1x4x128xf32>
    %9 = vector.shape_cast %8 : vector<1x4x128xf32> to vector<4x128xf32>
    %10 = arith.addf %7, %9 : vector<4x128xf32>
    %cst = arith.constant 2.500000e-01 : f32
    %11 = vector.broadcast %cst : f32 to vector<4x128xf32>
    %12 = arith.mulf %10, %11 : vector<4x128xf32>
    %c0_8 = arith.constant 0 : index
    %c0_9 = arith.constant 0 : index
    %13 = vector.load %arg2[%c0_8, %c0_9] : memref<4x128xf32, #tpu.memory_space<vmem>>, vector<4x128xf32>
    tpu.vector_store %arg2[%c0_8, %c0_9], %12 {strides = array<i32>} : memref<4x128xf32, #tpu.memory_space<vmem>>, vector<4x128xf32>,
    return
  }
  func.func @transform_0(%arg0: i32) -> (i32, i32, i32) {
    %c0_i32 = arith.constant 0 : i32
    %c0_i32_0 = arith.constant 0 : i32
    %c0_i32_1 = arith.constant 0 : i32
    return %c0_i32, %arg0, %c0_i32_0 : i32, i32, i32
  }
  func.func @transform_1(%arg0: i32) -> (i32, i32) {
    %c0_i32 = arith.constant 0 : i32
    %c0_i32_0 = arith.constant 0 : i32
    return %arg0, %c0_i32 : i32, i32
  }
}

</mosaic_0001>

<bundles_post_ra>
// kernel: tpu_custom_call.1
= control target key start
LH: loop header
LB: loop body
LE: loop exit
PB: predicated region body
PF: predicated region fallthrough
CT: control target
= control target key end

     0   :  { %6 = vsyncpa [#allocation3], 0  ;;  %s118_s0 = inlined_call_operand.hbm [shape: f32[4,4,128], index: 0, kind: input, shape index: {}]   ;;  %s119_s1 = inlined_call_operand.hbm [shape: f32[4,128], index: 1, kind: output, shape index: {}]  }
   0x1   :  { %7 = vsyncpa [#allocation4], 0  ;;  %s98_s6 = smov [#allocation2]  }
   0x2   :  { %s13_s7 = sshll.u32 %s98_s6, 4  ;;  %s14_s7 = int_to_ptr.vmem [resolvable:$true] %s13_s7 }
   0x3   :  { %s62_s8 = scalar_lea.vmem %s14_s7, 256  ;;  %p67_p1 = scmp.lt.s32.totalorder %s14_s7, %s14_s7 }
   0x4   :  { %p63_p0 = scmp.ne.s32.totalorder %s14_s7, %s62_s8  ;;  %p68_p2 = scmp.lt.s32.totalorder %s62_s8, %s62_s8 }
   0x6   :  { %p69_p3 = por %p68_p2, %p67_p1 }
   0x8   :  { %p70_p4 = pnand %p69_p3, %p63_p0 }
   0xa   :  { %73 = shalt.err (!%p70_p4)
}
   0xb   :  { %s99_s9 = smov 64   ;;  %s100_s10 = smov 4  }
   0xc   :  { %19 = dma.hbm_to_vmem [thread:$0]  %s118_s0, 256, %s14_s7, [#allocation3], %s99_s9, %s99_s9, %s100_s10  }
   0xd   :  { %94 = dma.done.wait [#allocation3], 256  }
   0xe   :  { %95 = vsyncadd [#allocation3], 4294967040  ;;  %v23_v0 = vld [vmem:[#allocation2] sm:$0xf]  ;;  %v25_v1 = vld [vmem:[#allocation2 + $0x4] sm:$0xf] }
   0xf   :  { %v28_v2 = vld [vmem:[#allocation2 + $0x8] sm:$0xf]  ;;  %v26_v3 = vadd.f32 %v25_v1, %v23_v0  ;;  %v31_v4 = vld [vmem:[#allocation2 + $0xc] sm:$0xf]  ;;  %s101_s13 = smov [#allocation5]  }
  0x10   :  { %s41_s14 = sshll.u32 %s101_s13, 4  ;;  %s42_s14 = int_to_ptr.vmem [resolvable:$true] %s41_s14 }
  0x11   :  { %v29_v5 = vadd.f32 %v28_v2, %v26_v3  ;;  %s74_s15 = scalar_lea.vmem %s42_s14, 64  ;;  %p79_p6 = scmp.lt.s32.totalorder %s42_s14, %s42_s14 }
  0x12   :  { %p75_p5 = scmp.ne.s32.totalorder %s42_s14, %s74_s15  ;;  %p80_p7 = scmp.lt.s32.totalorder %s74_s15, %s74_s15 }
  0x13   :  { %v32_v6 = vadd.f32 %v31_v4, %v29_v5 }
  0x14   :  { %p81_p8 = por %p80_p7, %p79_p6 }
  0x15   :  { %v33_v7 = vmul.f32 0.25, %v32_v6 }
  0x16   :  { %p82_p9 = pnand %p81_p8, %p75_p5 }
  0x17   :  { %34 = vst [vmem:[#allocation5] sm:$0xf] %v33_v7 }
  0x18   :  { %85 = shalt.err (!%p82_p9)
}
  0x19   :  { %44 = dma.vmem_to_hbm [thread:$0]  %s42_s14, 64, %s119_s1, [#allocation4]  }
  0x1a   :  { %96 = dma.done.wait [#allocation4], 64  }
  0x1b   :  { %97 = vsyncadd [#allocation4], 4294967232 }
  0x1c   :  { %48 = vsyncpa [#allocation3], 1 }
  0x1d   :  { %49 = vsyncpa [#allocation4], 1 }

</bundles_post_ra>
